<compile_context>
chip_gen: v6e
topology: v6e:2x2x1
jax: 0.10.0
libtpu: 0.0.40
codegen_flags: <defaults>
</compile_context>

<pallas_src>
import jax
import jax.numpy as jnp
from jax.experimental import pallas as pl
from jax.experimental.pallas import tpu as pltpu


def _round_up(x, m):
    return (x + m - 1) // m * m


def patch_embed_kernel(p_ref, w_ref, b_ref, o_ref):
    # p_ref: (TM, CPP) patches tile   w_ref: (CPP, D)   b_ref: (1, D) f32
    # o_ref: (TM, D)  -- one MXU GEMM per grid step, f32 accumulation,
    # lane-dense store with d_model on the lane axis.
    acc = jnp.dot(p_ref[...], w_ref[...], preferred_element_type=jnp.float32)
    o_ref[...] = (acc + b_ref[...]).astype(o_ref.dtype)


def _pick_tile_m(m, device_kind):
    # v5e: 4x128x128 MXU -> 128/256-row tiles already fill it and scoped VMEM
    # is tight; v6e/v7x: 2x256x256 MXU -> 256-512 rows per tile.
    cap = 256 if "v5" in device_kind.lower() else 512
    if m <= cap:
        return _round_up(m, 8)          # single grid step, sublane aligned
    for tm in (512, 384, 256, 128):     # prefer an exact divisor (no padding)
        if tm <= cap and m % tm == 0:
            return tm
    return cap                          # else pad M up to a multiple of cap


def my_patch_embed(x, weight, bias, *, patch_size):
    """x: (B, C, H, W); weight: (d_model, C, P, P) [torch layout]; bias: (d_model,)."""
    B, C, H, W = x.shape
    P = patch_size
    assert H % P == 0 and W % P == 0
    Hp, Wp = H // P, W // P
    N = Hp * Wp
    D = weight.shape[0]
    CPP = C * P * P
    M = B * N

    # Zero-FLOP im2col (space-to-depth), flattened over (B, N).  Marked fusible
    # below so XLA can compute it as part of the Pallas call's input instead of
    # round-tripping the full activation tensor through HBM.
    patches = (
        x.reshape(B, C, Hp, P, Wp, P)
        .transpose(0, 2, 4, 1, 3, 5)
        .reshape(M, CPP)
    )

    try:
        device_kind = jax.devices()[0].device_kind
    except Exception:  # pragma: no cover - defensive, backend should be TPU
        device_kind = ""
    TM = _pick_tile_m(M, device_kind)
    M_pad = _round_up(M, TM)
    if M_pad != M:
        patches = jnp.pad(patches, ((0, M_pad - M), (0, 0)))

    # Constant-fold layouts once: y = patches @ w_mat + b  (== torch x @ W.T + b).
    w_mat = weight.reshape(D, CPP).T                 # (CPP, D), no in-kernel transpose
    b_row = bias.reshape(1, D).astype(jnp.float32)   # f32: no per-step VPU cast

    itemsize = jnp.dtype(x.dtype).itemsize
    cost = pl.CostEstimate(
        flops=2 * M * CPP * D,
        transcendentals=0,
        bytes_accessed=(M * CPP + M * D) * itemsize
        + CPP * D * jnp.dtype(w_mat.dtype).itemsize
        + D * 4,
    )

    out = pl.pallas_call(
        patch_embed_kernel,
        out_shape=jax.ShapeDtypeStruct((M_pad, D), x.dtype),
        grid=(M_pad // TM,),
        in_specs=[
            pl.BlockSpec((TM, CPP), lambda t: (t, 0)),   # patches tile
            pl.BlockSpec((CPP, D), lambda t: (0, 0)),    # weight (constant block)
            pl.BlockSpec((1, D), lambda t: (0, 0)),      # bias   (constant block)
        ],
        out_specs=pl.BlockSpec((TM, D), lambda t: (t, 0)),
        compiler_params=pltpu.CompilerParams(
            dimension_semantics=("parallel",),
            # TODO(synk): on a known-v7x deployment use pltpu.CORE_PARALLEL here
            # (2 TCs/chip); "parallel" is the portable, safe choice.
            allow_input_fusion=[True, False, False],
            vmem_limit_bytes=64 * 1024 * 1024,
        ),
        cost_estimate=cost,
    )(patches, w_mat, b_row)

    return out[:M].reshape(B, N, D)


def reference_patch_embed(x, weight, bias, *, patch_size):
    """Pure-JAX reference mirroring the PyTorch forward (conv -> flatten -> transpose)."""
    P = patch_size
    out = jax.lax.conv_general_dilated(
        x, weight, window_strides=(P, P), padding="VALID",
        dimension_numbers=("NCHW", "OIHW", "NCHW"),
        precision=jax.lax.Precision.HIGHEST)
    out = out + bias.reshape(1, -1, 1, 1)
    B, D, Hp, Wp = out.shape
    return out.reshape(B, D, Hp * Wp).transpose(0, 2, 1)


if __name__ == "__main__":
    # Shapes implied by the module defaults: img_size=32, patch_size=4,
    # in_chans=3, d_model=32.
    B, C, IMG, P, D = 2, 3, 32, 4, 32

    key = jax.random.PRNGKey(0)
    kx, kw, kb = jax.random.split(key, 3)

    x = jax.random.normal(kx, (B, C, IMG, IMG), dtype=jnp.float32)
    weight = jax.random.normal(kw, (D, C, P, P), dtype=jnp.float32) * 0.05
    bias = jax.random.normal(kb, (D,), dtype=jnp.float32) * 0.05

    out = jax.block_until_ready(my_patch_embed(x, weight, bias, patch_size=P))

    ref = reference_patch_embed(x, weight, bias, patch_size=P)
    N = (IMG // P) * (IMG // P)
    assert out.shape == (B, N, D)
    assert jnp.allclose(out, ref, atol=1e-4, rtol=1e-4), "mismatch vs reference"

    print("KERNEL_OK")
</pallas_src>

<mosaic_0001>
module attributes {stable_mosaic.version = 11 : i64} {
  func.func @patch_embed_kernel(%arg0: i32, %arg1: memref<128x48xf32, #tpu.memory_space<vmem>>, %arg2: memref<48x32xf32, #tpu.memory_space<vmem>>, %arg3: memref<1x32xf32, #tpu.memory_space<vmem>>, %arg4: memref<128x32xf32, #tpu.memory_space<vmem>>) attributes {dimension_semantics = [#tpu.dimension_semantics<parallel>], iteration_bounds = array<i64: 1>, scalar_prefetch = 0 : i64, scratch_operands = 0 : i64, tpu.core_type = #tpu.core_type<tc>, window_params = [{transform_indices = @transform_0, window_bounds = array<i64: 128, 48>}, {pipeline_mode = #tpu.pipeline_mode<synchronous>, transform_indices = @transform_1, window_bounds = array<i64: 48, 32>}, {pipeline_mode = #tpu.pipeline_mode<synchronous>, transform_indices = @transform_2, window_bounds = array<i64: 1, 32>}, {transform_indices = @transform_3, window_bounds = array<i64: 128, 32>}]} {
    %c0 = arith.constant 0 : index
    %c0_0 = arith.constant 0 : index
    %0 = vector.load %arg1[%c0, %c0_0] : memref<128x48xf32, #tpu.memory_space<vmem>>, vector<128x48xf32>
    %c0_1 = arith.constant 0 : index
    %c0_2 = arith.constant 0 : index
    %1 = vector.load %arg2[%c0_1, %c0_2] : memref<48x32xf32, #tpu.memory_space<vmem>>, vector<48x32xf32>
    %cst = arith.constant dense<0.000000e+00> : vector<128x32xf32>
    %2 = tpu.matmul %0, %1, %cst {dimension_numbers = #tpu.dot_dimension_numbers<[1], [0], [0], [1], [0, 0, 1, 1], [], []>} : vector<128x48xf32>, vector<48x32xf32>, vector<128x32xf32> -> vector<128x32xf32>
    %c0_3 = arith.constant 0 : index
    %c0_4 = arith.constant 0 : index
    %3 = vector.load %arg3[%c0_3, %c0_4] : memref<1x32xf32, #tpu.memory_space<vmem>>, vector<1x32xf32>
    %4 = vector.broadcast %3 : vector<1x32xf32> to vector<128x32xf32>
    %5 = arith.addf %2, %4 : vector<128x32xf32>
    %c0_5 = arith.constant 0 : index
    %c0_6 = arith.constant 0 : index
    %6 = vector.load %arg4[%c0_5, %c0_6] : memref<128x32xf32, #tpu.memory_space<vmem>>, vector<128x32xf32>
    tpu.vector_store %arg4[%c0_5, %c0_6], %5 {strides = array<i32>} : memref<128x32xf32, #tpu.memory_space<vmem>>, vector<128x32xf32>,
    return
  }
  func.func @transform_0(%arg0: i32) -> (i32, i32) {
    %c0_i32 = arith.constant 0 : i32
    %c0_i32_0 = arith.constant 0 : i32
    return %arg0, %c0_i32 : i32, i32
  }
  func.func @transform_1(%arg0: i32) -> (i32, i32) {
    %c0_i32 = arith.constant 0 : i32
    %c0_i32_0 = arith.constant 0 : i32
    %c0_i32_1 = arith.constant 0 : i32
    return %c0_i32, %c0_i32_0 : i32, i32
  }
  func.func @transform_2(%arg0: i32) -> (i32, i32) {
    %c0_i32 = arith.constant 0 : i32
    %c0_i32_0 = arith.constant 0 : i32
    %c0_i32_1 = arith.constant 0 : i32
    return %c0_i32, %c0_i32_0 : i32, i32
  }
  func.func @transform_3(%arg0: i32) -> (i32, i32) {
    %c0_i32 = arith.constant 0 : i32
    %c0_i32_0 = arith.constant 0 : i32
    return %arg0, %c0_i32 : i32, i32
  }
}

</mosaic_0001>

<bundles_post_ra>
// kernel: tpu_custom_call.1
= control target key start
LH: loop header
LB: loop body
LE: loop exit
PB: predicated region body
PF: predicated region fallthrough
CT: control target
= control target key end

     0   :  { %vm43_vm0 = vcmask 392192   ;;  %vm237_vm1 = vcmask 261120   ;;  %s514_s1 = inlined_call_operand.vmem [shape: f32[48,32], index: 1, kind: input, shape index: {}]   ;;  %s515_s0 = inlined_call_operand.vmem [shape: f32[128,48], index: 0, kind: input, shape index: {}]   ;;  %s516_s2 = inlined_call_operand.vmem [shape: f32[1,32], index: 2, kind: input, shape index: {}]   ;;  %s517_s3 = inlined_call_operand.vmem [shape: f32[128,32], index: 3, kind: output, shape index: {}]  }
   0x1   :  { %v35_v0 = vld [vmem:[%s514_s1 + $0x28] sm:$0xff]  ;;  %v34_v1 = vld [vmem:[%s514_s1 + $0x20] sm:$0xff]  ;;  %v33_v2 = vld [vmem:[%s514_s1 + $0x18] sm:$0xff] }
   0x2   :  { %297 = vmatprep.subr.mxu0 %v35_v0  ;;  %333 = vmatprep.subr.mxu1 %v35_v0  ;;  %v32_v3 = vld [vmem:[%s514_s1 + $0x10] sm:$0xff]  ;;  %v31_v4 = vld [vmem:[%s514_s1 + $0x8] sm:$0xff]  ;;  %v30_v5 = vld [vmem:[%s514_s1] sm:$0xff] }
   0x3   :  { %298 = vmatpush3.msra.mxu0 %v35_v0  ;;  %339 = vmatpush3.msra.mxu1 %v35_v0  ;;  %v14_v6 = vld [vmem:[%s515_s0] sm:$0xff]  ;;  %v15_v8 = vld [vmem:[%s515_s0 + $0x8] sm:$0xff]  ;;  %v16_v10 = vld [vmem:[%s515_s0 + $0x10] sm:$0xff] }
   0x4   :  { %299 = vmatprep.subr.mxu0 %v34_v1  ;;  %334 = vmatprep.subr.mxu1 %v34_v1  ;;  %v22_v7 = vld [vmem:[%s515_s0 + $0x40] sm:$0xff]  ;;  %v23_v9 = vld [vmem:[%s515_s0 + $0x48] sm:$0xff]  ;;  %v24_v11 = vld [vmem:[%s515_s0 + $0x50] sm:$0xff] }
   0x5   :  { %300 = vmatpush3.msra.mxu0 %v34_v1  ;;  %340 = vmatpush3.msra.mxu1 %v34_v1  ;;  %v17_v12 = vld [vmem:[%s515_s0 + $0x18] sm:$0xff]  ;;  %v18_v14 = vld [vmem:[%s515_s0 + $0x20] sm:$0xff]  ;;  %v19_v16 = vld [vmem:[%s515_s0 + $0x28] sm:$0xff] }
   0x6   :  { %301 = vmatprep.subr.mxu0 %v33_v2  ;;  %335 = vmatprep.subr.mxu1 %v33_v2  ;;  %v25_v13 = vld [vmem:[%s515_s0 + $0x58] sm:$0xff]  ;;  %v26_v15 = vld [vmem:[%s515_s0 + $0x60] sm:$0xff]  ;;  %v27_v17 = vld [vmem:[%s515_s0 + $0x68] sm:$0xff] }
   0x7   :  { %302 = vmatpush3.msra.mxu0 %v33_v2  ;;  %341 = vmatpush3.msra.mxu1 %v33_v2  ;;  %v20_v18 = vld [vmem:[%s515_s0 + $0x30] sm:$0xff]  ;;  %v21_v20 = vld [vmem:[%s515_s0 + $0x38] sm:$0xff]  ;;  %v258_v22 = vld [vmem:[%s516_s2] ss:$0 sm:$0xff] }
   0x8   :  { %303 = vmatprep.subr.mxu0 %v32_v3  ;;  %336 = vmatprep.subr.mxu1 %v32_v3  ;;  %v28_v19 = vld [vmem:[%s515_s0 + $0x70] sm:$0xff]  ;;  %v29_v21 = vld [vmem:[%s515_s0 + $0x78] sm:$0xff] }
   0x9   :  { %304 = vmatpush3.msra.mxu0 %v32_v3  ;;  %342 = vmatpush3.msra.mxu1 %v32_v3 }
   0xa   :  { %305 = vmatprep.subr.mxu0 %v31_v4  ;;  %337 = vmatprep.subr.mxu1 %v31_v4 }
   0xb   :  { %306 = vmatpush3.msra.mxu0 %v31_v4  ;;  %343 = vmatpush3.msra.mxu1 %v31_v4 }
   0xc   :  { %307 = vmatprep.subr.mxu0 %v30_v5  ;;  %338 = vmatprep.subr.mxu1 %v30_v5 }
   0xd   :  { %308 = vmatpush3.msra.mxu0 %v30_v5  ;;  %344 = vmatpush3.msra.mxu1 %v30_v5 }
   0xe   :  { %309 = vmatprep.mubr.msk.f32.mxu0 %vm43_vm0, %v14_v6  ;;  %321 = vmatprep.mubr.msk.f32.mxu1 %vm43_vm0, %v22_v7 }
   0xf   :  { %310 = vmatmul.mubr.msk.f32.vlgmr.msra.gmra.mxu0 %vm43_vm0, %v15_v8  ;;  %322 = vmatmul.mubr.msk.f32.vlgmr.msra.gmra.mxu1 %vm43_vm0, %v23_v9 }
  0x10   :  { %312 = vmatprep.mubr.msk.f32.mxu0 %vm43_vm0, %v16_v10  ;;  %324 = vmatprep.mubr.msk.f32.mxu1 %vm43_vm0, %v24_v11 }
  0x13   :  { %313 = vmatmul.mubr.msk.f32.gmra.mxu0 %vm43_vm0, %v17_v12  ;;  %325 = vmatmul.mubr.msk.f32.gmra.mxu1 %vm43_vm0, %v25_v13 }
  0x14   :  { %315 = vmatprep.mubr.msk.f32.mxu0 %vm43_vm0, %v18_v14  ;;  %327 = vmatprep.mubr.msk.f32.mxu1 %vm43_vm0, %v26_v15 }
  0x17   :  { %316 = vmatmul.mubr.msk.f32.gmra.mxu0 %vm43_vm0, %v19_v16  ;;  %328 = vmatmul.mubr.msk.f32.gmra.mxu1 %vm43_vm0, %v27_v17 }
  0x18   :  { %318 = vmatprep.mubr.msk.f32.mxu0 %vm43_vm0, %v20_v18  ;;  %330 = vmatprep.mubr.msk.f32.mxu1 %vm43_vm0, %v28_v19 }
  0x1b   :  { %319 = vmatmul.mubr.msk.f32.gmra.mxu0 %vm43_vm0, %v21_v20  ;;  %331 = vmatmul.mubr.msk.f32.gmra.mxu1 %vm43_vm0, %v29_v21 }
  0xcf   :  { %v311_v23 = vpop.f32.mrf.mxu0  ;;  %v323_v24 = vpop.f32.mrf.mxu1 }
  0xd0   :  { %v164_v25 = vadd.f32 %v311_v23, %v258_v22  ;;  %v204_v26 = vadd.f32 %v323_v24, %v258_v22 }
  0xd1   :  { %v158_v27 = vpop.f32.mrf.mxu0  ;;  %v198_v28 = vpop.f32.mrf.mxu1 }
  0xd2   :  { %239 = vst.msk [vmem:[%s517_s3 + $0x8] sm:$0xff] %vm237_vm1, %v164_v25  ;;  %247 = vst.msk [vmem:[%s517_s3 + $0x48] sm:$0xff] %vm237_vm1, %v204_v26  ;;  %v159_v29 = vadd.f32 %v258_v22, %v158_v27  ;;  %v199_v30 = vadd.f32 %v258_v22, %v198_v28 }
  0xd3   :  { %v314_v31 = vpop.f32.mrf.mxu0  ;;  %v326_v32 = vpop.f32.mrf.mxu1 }
  0xd4   :  { %238 = vst.msk [vmem:[%s517_s3] sm:$0xff] %vm237_vm1, %v159_v29  ;;  %246 = vst.msk [vmem:[%s517_s3 + $0x40] sm:$0xff] %vm237_vm1, %v199_v30  ;;  %v174_v33 = vadd.f32 %v314_v31, %v258_v22  ;;  %v214_v34 = vadd.f32 %v326_v32, %v258_v22 }
  0xd5   :  { %v168_v35 = vpop.f32.mrf.mxu0  ;;  %v208_v36 = vpop.f32.mrf.mxu1 }
  0xd6   :  { %241 = vst.msk [vmem:[%s517_s3 + $0x18] sm:$0xff] %vm237_vm1, %v174_v33  ;;  %249 = vst.msk [vmem:[%s517_s3 + $0x58] sm:$0xff] %vm237_vm1, %v214_v34  ;;  %v169_v37 = vadd.f32 %v258_v22, %v168_v35  ;;  %v209_v38 = vadd.f32 %v258_v22, %v208_v36 }
  0xd7   :  { %v317_v39 = vpop.f32.mrf.mxu0  ;;  %v329_v40 = vpop.f32.mrf.mxu1 }
  0xd8   :  { %240 = vst.msk [vmem:[%s517_s3 + $0x10] sm:$0xff] %vm237_vm1, %v169_v37  ;;  %248 = vst.msk [vmem:[%s517_s3 + $0x50] sm:$0xff] %vm237_vm1, %v209_v38  ;;  %v184_v41 = vadd.f32 %v317_v39, %v258_v22  ;;  %v224_v42 = vadd.f32 %v329_v40, %v258_v22 }
  0xd9   :  { %v178_v43 = vpop.f32.mrf.mxu0  ;;  %v218_v44 = vpop.f32.mrf.mxu1 }
  0xda   :  { %243 = vst.msk [vmem:[%s517_s3 + $0x28] sm:$0xff] %vm237_vm1, %v184_v41  ;;  %251 = vst.msk [vmem:[%s517_s3 + $0x68] sm:$0xff] %vm237_vm1, %v224_v42  ;;  %v179_v45 = vadd.f32 %v258_v22, %v178_v43  ;;  %v219_v46 = vadd.f32 %v258_v22, %v218_v44 }
  0xdb   :  { %v320_v47 = vpop.f32.mrf.mxu0  ;;  %v332_v48 = vpop.f32.mrf.mxu1 }
  0xdc   :  { %242 = vst.msk [vmem:[%s517_s3 + $0x20] sm:$0xff] %vm237_vm1, %v179_v45  ;;  %250 = vst.msk [vmem:[%s517_s3 + $0x60] sm:$0xff] %vm237_vm1, %v219_v46  ;;  %v194_v49 = vadd.f32 %v320_v47, %v258_v22  ;;  %v234_v50 = vadd.f32 %v332_v48, %v258_v22 }
  0xdd   :  { %v188_v51 = vpop.f32.mrf.mxu0  ;;  %v228_v52 = vpop.f32.mrf.mxu1 }
  0xde   :  { %245 = vst.msk [vmem:[%s517_s3 + $0x38] sm:$0xff] %vm237_vm1, %v194_v49  ;;  %253 = vst.msk [vmem:[%s517_s3 + $0x78] sm:$0xff] %vm237_vm1, %v234_v50  ;;  %v189_v53 = vadd.f32 %v258_v22, %v188_v51  ;;  %v229_v54 = vadd.f32 %v258_v22, %v228_v52 }
  0xe0   :  { %244 = vst.msk [vmem:[%s517_s3 + $0x30] sm:$0xff] %vm237_vm1, %v189_v53  ;;  %252 = vst.msk [vmem:[%s517_s3 + $0x70] sm:$0xff] %vm237_vm1, %v229_v54 }

</bundles_post_ra>
